<compile_context>
chip_gen: v7x
topology: tpu7x:2x2x1
jax: 0.10.0
libtpu: 0.0.40
codegen_flags: <defaults>
</compile_context>

<pallas_src>
import functools

import jax
import jax.numpy as jnp
from jax import lax
from jax.experimental import pallas as pl
from jax.experimental.pallas import tpu as pltpu

_LANE = 128
_MIB = 1024 * 1024


def _round_up(x, m):
    return (x + m - 1) // m * m


def mlp_kernel(x_ref, w1_ref, b1_ref, w2_ref, b2_ref, out_ref, *, precision):
    # In-kernel downcast of the streamed operand: x arrives at its native dtype, so total
    # x HBM traffic is a single read (no separate wrapper cast pass).
    x = x_ref[...].astype(w1_ref.dtype)
    # Hidden layer: h = relu(x @ W1 + b1) — MXU matmul, f32 accumulate, f32 bias/ReLU.
    h = jnp.dot(x, w1_ref[...], preferred_element_type=jnp.float32, precision=precision)
    h = jnp.maximum(h + b1_ref[...], 0.0)
    # Output layer: y = h @ W2 + b2. Deliberate downcast of the f32 activations to the
    # weight dtype for the second MXU matmul; accumulation stays f32.
    y = jnp.dot(h.astype(w2_ref.dtype), w2_ref[...],
                preferred_element_type=jnp.float32, precision=precision)
    out_ref[...] = (y + b2_ref[...]).astype(out_ref.dtype)


def net_forward(x, w1, b1, w2, b2, *, block_b=None, compute_dtype=jnp.bfloat16,
                out_dtype=None):
    """Fused 2-layer MLP forward.

    x: (B, F); w1: (F, H); b1: (1, H) or (H,); w2: (H, O); b2: (1, O) or (O,).
    Returns (B, O) in `out_dtype` (default: x.dtype). Matmuls run in `compute_dtype`
    (bf16 by default -> x/input mantissa is intentionally truncated), accumulation /
    bias / ReLU in f32.
    """
    B, F = x.shape
    H = w1.shape[1]
    O = w2.shape[1]
    cd = jnp.dtype(compute_dtype)
    out_dtype = jnp.dtype(out_dtype) if out_dtype is not None else jnp.dtype(x.dtype)
    x_item = jnp.dtype(x.dtype).itemsize
    out_item = out_dtype.itemsize

    # ---- generation-aware VMEM capacity (v5e/v6e: 128 MiB, v7x: 64 MiB per core) -------
    try:
        vmem_cap = int(getattr(pltpu.get_tpu_info(), "vmem_capacity_bytes", 64 * _MIB))
    except Exception:
        vmem_cap = 64 * _MIB
    vmem_budget = int(0.80 * vmem_cap)

    # ---- lane-dense padding of weight-resident dims (exact: zero cols/rows) ------------
    Hp = _round_up(H, _LANE)
    Op = _round_up(O, _LANE)
    # Pad the contraction dim only when it is misaligned AND the blow-up is modest;
    # a ragged small F is legal (block dim == full array dim) and padding it would
    # multiply the streamed x bytes.
    Fp = _round_up(F, _LANE)
    if F % _LANE == 0 or Fp > F + F // 4:
        Fp = F

    # ---- batch tile: 16-row multiples (bf16 sublane pack), generation-aware size -------
    row_align = 16 if cd.itemsize < 4 else 8
    if block_b is None:
        block_b = 256 if vmem_cap <= 64 * _MIB else 1024
    TB = min(_round_up(block_b, row_align), _round_up(B, row_align))

    def vmem_need(tb, wbuf=2):
        return (2 * tb * Fp * x_item                       # x tiles (double-buffered)
                + tb * Fp * cd.itemsize                    # in-kernel x downcast copy
                + tb * Hp * 4 + tb * Hp * cd.itemsize      # h (f32) + its bf16 downcast
                + tb * Op * 4                              # y (f32)
                + 2 * tb * Op * out_item                   # out tiles (double-buffered)
                + wbuf * (Fp * Hp + Hp * Op) * cd.itemsize  # W1, W2
                + wbuf * (Hp + Op) * 4)                    # biases (f32)

    while TB > row_align and vmem_need(TB) > vmem_budget:
        TB = max(row_align, _round_up(TB // 2, row_align))
    # TODO(synk): weight-streaming fallback (contraction-tiled grid + f32 accumulator
    # scratch) when F*Hp + Hp*Op in compute_dtype exceeds ~1/3 of per-core VMEM (v7x, H>~2k).

    Bp = _round_up(B, TB)
    NB = Bp // TB
    # If the batch grid can't feed two TensorCores, split the output dim instead.
    NJ = 2 if (NB < 2 and Op >= 2 * _LANE and Op % (2 * _LANE) == 0) else 1
    Oj = Op // NJ

    # ---- wrapper-side padding: weights always; x only for batch / optional F pad -------
    xp = x
    if Bp != B or Fp != F:
        xp = jnp.pad(x, ((0, Bp - B), (0, Fp - F)))
    w1p = jnp.pad(w1.astype(cd), ((0, Fp - F), (0, Hp - H)))
    b1p = jnp.pad(b1.astype(jnp.float32).reshape(1, H), ((0, 0), (0, Hp - H)))
    w2p = jnp.pad(w2.astype(cd), ((0, Hp - H), (0, Op - O)))
    b2p = jnp.pad(b2.astype(jnp.float32).reshape(1, O), ((0, 0), (0, Op - O)))

    precision = (lax.Precision.HIGHEST if cd == jnp.dtype(jnp.float32)
                 else lax.Precision.DEFAULT)
    kernel = functools.partial(mlp_kernel, precision=precision)

    flops = 2 * Bp * Fp * Hp + 2 * Bp * Hp * Op
    bytes_accessed = (xp.size * x_item
                      + w1p.size * cd.itemsize + w2p.size * cd.itemsize
                      + (b1p.size + b2p.size) * 4
                      + Bp * Op * out_item)

    def run(single_buffer_weights):
        wbuf = 1 if single_buffer_weights else 2
        vmem_limit = int(min(0.85 * vmem_cap,
                             max(2 * vmem_need(TB, wbuf), 32 * _MIB)))

        def w_spec(shape, index_map, constant):
            # Constant-index-map (resident) blocks: nothing to pipeline -> 1 buffer.
            if constant and single_buffer_weights:
                return pl.BlockSpec(shape, index_map, pipeline_mode=pl.Buffered(1))
            return pl.BlockSpec(shape, index_map)

        in_specs = [
            pl.BlockSpec((TB, Fp), lambda i, j: (i, 0)),      # x: tiled over batch
            w_spec((Fp, Hp), lambda i, j: (0, 0), True),      # W1: resident
            w_spec((1, Hp), lambda i, j: (0, 0), True),       # b1: resident
            w_spec((Hp, Oj), lambda i, j: (0, j), NJ == 1),   # W2 (split over j if NJ=2)
            w_spec((1, Oj), lambda i, j: (0, j), NJ == 1),    # b2
        ]
        return pl.pallas_call(
            kernel,
            out_shape=jax.ShapeDtypeStruct((Bp, Op), out_dtype),
            grid_spec=pltpu.PrefetchScalarGridSpec(
                num_scalar_prefetch=0,
                grid=(NB, NJ),
                in_specs=in_specs,
                out_specs=pl.BlockSpec((TB, Oj), lambda i, j: (i, j)),
            ),
            compiler_params=pltpu.CompilerParams(
                dimension_semantics=("parallel", "parallel"),
                vmem_limit_bytes=vmem_limit,
            ),
            cost_estimate=pl.CostEstimate(
                flops=flops, transcendentals=0, bytes_accessed=bytes_accessed),
        )(xp, w1p, b1p, w2p, b2p)

    try:
        out_padded = run(True)    # single-buffered resident weights (saves VMEM)
    except Exception:
        out_padded = run(False)   # fall back to default double-buffering

    # Slice away batch / lane padding.
    return out_padded[:B, :O]


def init_params(key, n_feature, n_hidden, n_output, dtype=jnp.float32):
    """Deterministic init mimicking torch.nn.Linear default (U[-1/sqrt(fan_in), +])."""
    k1, k2, k3, k4 = jax.random.split(key, 4)
    bound1 = 1.0 / (n_feature ** 0.5)
    bound2 = 1.0 / (n_hidden ** 0.5)
    w1 = jax.random.uniform(k1, (n_feature, n_hidden), dtype, -bound1, bound1)
    b1 = jax.random.uniform(k2, (1, n_hidden), dtype, -bound1, bound1)
    w2 = jax.random.uniform(k3, (n_hidden, n_output), dtype, -bound2, bound2)
    b2 = jax.random.uniform(k4, (1, n_output), dtype, -bound2, bound2)
    return w1, b1, w2, b2


if __name__ == "__main__":
    # Small shapes consistent with Net(n_feature, n_hidden, n_output).
    # NOTE: at this demo size fixed pallas_call overhead dominates; the kernel pays off
    # for B in the thousands and F/H >= 128.
    batch, n_feature, n_hidden, n_output = 8, 16, 32, 4

    key = jax.random.PRNGKey(0)
    kx, kp = jax.random.split(key)
    x = jax.random.normal(kx, (batch, n_feature), jnp.float32)
    w1, b1, w2, b2 = init_params(kp, n_feature, n_hidden, n_output)

    # Pure-JAX f32 reference.
    ref = jnp.maximum(x @ w1 + b1, 0.0) @ w2 + b2

    # Exact path (f32 matmuls, HIGHEST precision) — tight tolerance.
    out_f32 = net_forward(x, w1, b1, w2, b2, compute_dtype=jnp.float32)
    jax.block_until_ready(out_f32)
    assert out_f32.shape == (batch, n_output)
    assert jnp.allclose(out_f32, ref, atol=1e-5, rtol=1e-5), "f32 mismatch vs reference"

    # Fast path (bf16 matmuls, f32 accumulate) — bf16-level tolerance.
    out_bf16 = net_forward(x, w1, b1, w2, b2, compute_dtype=jnp.bfloat16)
    jax.block_until_ready(out_bf16)
    assert out_bf16.shape == (batch, n_output)
    assert jnp.allclose(out_bf16, ref, atol=2e-2, rtol=2e-2), "bf16 mismatch vs reference"

    print("KERNEL_OK")
</pallas_src>

<mosaic_0001>
module attributes {stable_mosaic.version = 11 : i64} {
  func.func @mlp_kernel(%arg0: i32, %arg1: i32, %arg2: memref<8x16xf32, #tpu.memory_space<vmem>>, %arg3: memref<16x128xf32, #tpu.memory_space<vmem>>, %arg4: memref<1x128xf32, #tpu.memory_space<vmem>>, %arg5: memref<128x128xf32, #tpu.memory_space<vmem>>, %arg6: memref<1x128xf32, #tpu.memory_space<vmem>>, %arg7: memref<8x128xf32, #tpu.memory_space<vmem>>) attributes {dimension_semantics = [#tpu.dimension_semantics<parallel>, #tpu.dimension_semantics<parallel>], iteration_bounds = array<i64: 1, 1>, scalar_prefetch = 0 : i64, scratch_operands = 0 : i64, tpu.core_type = #tpu.core_type<tc>, window_params = [{transform_indices = @transform_0, window_bounds = array<i64: 8, 16>}, {pipeline_mode = #tpu.pipeline_mode<synchronous>, transform_indices = @transform_1, window_bounds = array<i64: 16, 128>}, {pipeline_mode = #tpu.pipeline_mode<synchronous>, transform_indices = @transform_2, window_bounds = array<i64: 1, 128>}, {pipeline_mode = #tpu.pipeline_mode<synchronous>, transform_indices = @transform_3, window_bounds = array<i64: 128, 128>}, {pipeline_mode = #tpu.pipeline_mode<synchronous>, transform_indices = @transform_4, window_bounds = array<i64: 1, 128>}, {transform_indices = @transform_5, window_bounds = array<i64: 8, 128>}]} {
    %c0 = arith.constant 0 : index
    %c0_0 = arith.constant 0 : index
    %0 = vector.load %arg2[%c0, %c0_0] : memref<8x16xf32, #tpu.memory_space<vmem>>, vector<8x16xf32>
    %c0_1 = arith.constant 0 : index
    %c0_2 = arith.constant 0 : index
    %1 = vector.load %arg3[%c0_1, %c0_2] : memref<16x128xf32, #tpu.memory_space<vmem>>, vector<16x128xf32>
    %cst = arith.constant dense<0.000000e+00> : vector<8x128xf32>
    %2 = tpu.matmul %0, %1, %cst {dimension_numbers = #tpu.dot_dimension_numbers<[1], [0], [0], [1], [0, 0, 1, 1], [], []>, precision = #tpu.contract_precision<fp32>} : vector<8x16xf32>, vector<16x128xf32>, vector<8x128xf32> -> vector<8x128xf32>
    %c0_3 = arith.constant 0 : index
    %c0_4 = arith.constant 0 : index
    %3 = vector.load %arg4[%c0_3, %c0_4] : memref<1x128xf32, #tpu.memory_space<vmem>>, vector<1x128xf32>
    %4 = vector.broadcast %3 : vector<1x128xf32> to vector<8x128xf32>
    %5 = arith.addf %2, %4 : vector<8x128xf32>
    %cst_5 = arith.constant 0.000000e+00 : f32
    %6 = vector.broadcast %cst_5 : f32 to vector<8x128xf32>
    %7 = arith.maximumf %5, %6 : vector<8x128xf32>
    %c0_6 = arith.constant 0 : index
    %c0_7 = arith.constant 0 : index
    %8 = vector.load %arg5[%c0_6, %c0_7] : memref<128x128xf32, #tpu.memory_space<vmem>>, vector<128x128xf32>
    %cst_8 = arith.constant dense<0.000000e+00> : vector<8x128xf32>
    %9 = tpu.matmul %7, %8, %cst_8 {dimension_numbers = #tpu.dot_dimension_numbers<[1], [0], [0], [1], [0, 0, 1, 1], [], []>, precision = #tpu.contract_precision<fp32>} : vector<8x128xf32>, vector<128x128xf32>, vector<8x128xf32> -> vector<8x128xf32>
    %c0_9 = arith.constant 0 : index
    %c0_10 = arith.constant 0 : index
    %10 = vector.load %arg6[%c0_9, %c0_10] : memref<1x128xf32, #tpu.memory_space<vmem>>, vector<1x128xf32>
    %11 = vector.broadcast %10 : vector<1x128xf32> to vector<8x128xf32>
    %12 = arith.addf %9, %11 : vector<8x128xf32>
    %c0_11 = arith.constant 0 : index
    %c0_12 = arith.constant 0 : index
    %13 = vector.load %arg7[%c0_11, %c0_12] : memref<8x128xf32, #tpu.memory_space<vmem>>, vector<8x128xf32>
    tpu.vector_store %arg7[%c0_11, %c0_12], %12 {strides = array<i32>} : memref<8x128xf32, #tpu.memory_space<vmem>>, vector<8x128xf32>,
    return
  }
  func.func @transform_0(%arg0: i32, %arg1: i32) -> (i32, i32) {
    %c0_i32 = arith.constant 0 : i32
    %c0_i32_0 = arith.constant 0 : i32
    return %arg0, %c0_i32 : i32, i32
  }
  func.func @transform_1(%arg0: i32, %arg1: i32) -> (i32, i32) {
    %c0_i32 = arith.constant 0 : i32
    %c0_i32_0 = arith.constant 0 : i32
    %c0_i32_1 = arith.constant 0 : i32
    return %c0_i32, %c0_i32_0 : i32, i32
  }
  func.func @transform_2(%arg0: i32, %arg1: i32) -> (i32, i32) {
    %c0_i32 = arith.constant 0 : i32
    %c0_i32_0 = arith.constant 0 : i32
    %c0_i32_1 = arith.constant 0 : i32
    return %c0_i32, %c0_i32_0 : i32, i32
  }
  func.func @transform_3(%arg0: i32, %arg1: i32) -> (i32, i32) {
    %c0_i32 = arith.constant 0 : i32
    %c0_i32_0 = arith.constant 0 : i32
    return %c0_i32, %arg1 : i32, i32
  }
  func.func @transform_4(%arg0: i32, %arg1: i32) -> (i32, i32) {
    %c0_i32 = arith.constant 0 : i32
    %c0_i32_0 = arith.constant 0 : i32
    return %c0_i32, %arg1 : i32, i32
  }
  func.func @transform_5(%arg0: i32, %arg1: i32) -> (i32, i32) {
    %c0_i32 = arith.constant 0 : i32
    return %arg0, %arg1 : i32, i32
  }
}

module attributes {stable_mosaic.version = 11 : i64} {
  func.func @mlp_kernel(%arg0: i32, %arg1: i32, %arg2: memref<8x16xf32, #tpu.memory_space<vmem>>, %arg3: memref<16x128xf32, #tpu.memory_space<vmem>>, %arg4: memref<1x128xf32, #tpu.memory_space<vmem>>, %arg5: memref<128x128xf32, #tpu.memory_space<vmem>>, %arg6: memref<1x128xf32, #tpu.memory_space<vmem>>, %arg7: memref<8x128xf32, #tpu.memory_space<vmem>>) attributes {dimension_semantics = [#tpu.dimension_semantics<parallel>, #tpu.dimension_semantics<parallel>], iteration_bounds = array<i64: 1, 1>, scalar_prefetch = 0 : i64, scratch_operands = 0 : i64, tpu.core_type = #tpu.core_type<tc>, window_params = [{transform_indices = @transform_0, window_bounds = array<i64: 8, 16>}, {pipeline_mode = #tpu.pipeline_mode<synchronous>, transform_indices = @transform_1, window_bounds = array<i64: 16, 128>}, {pipeline_mode = #tpu.pipeline_mode<synchronous>, transform_indices = @transform_2, window_bounds = array<i64: 1, 128>}, {transform_indices = @transform_3, window_bounds = array<i64: 128, 128>}, {transform_indices = @transform_4, window_bounds = array<i64: 1, 128>}, {transform_indices = @transform_5, window_bounds = array<i64: 8, 128>}]} {
    %c0 = arith.constant 0 : index
    %c0_0 = arith.constant 0 : index
    %0 = vector.load %arg2[%c0, %c0_0] : memref<8x16xf32, #tpu.memory_space<vmem>>, vector<8x16xf32>
    %c0_1 = arith.constant 0 : index
    %c0_2 = arith.constant 0 : index
    %1 = vector.load %arg3[%c0_1, %c0_2] : memref<16x128xf32, #tpu.memory_space<vmem>>, vector<16x128xf32>
    %cst = arith.constant dense<0.000000e+00> : vector<8x128xf32>
    %2 = tpu.matmul %0, %1, %cst {dimension_numbers = #tpu.dot_dimension_numbers<[1], [0], [0], [1], [0, 0, 1, 1], [], []>, precision = #tpu.contract_precision<fp32>} : vector<8x16xf32>, vector<16x128xf32>, vector<8x128xf32> -> vector<8x128xf32>
    %c0_3 = arith.constant 0 : index
    %c0_4 = arith.constant 0 : index
    %3 = vector.load %arg4[%c0_3, %c0_4] : memref<1x128xf32, #tpu.memory_space<vmem>>, vector<1x128xf32>
    %4 = vector.broadcast %3 : vector<1x128xf32> to vector<8x128xf32>
    %5 = arith.addf %2, %4 : vector<8x128xf32>
    %cst_5 = arith.constant 0.000000e+00 : f32
    %6 = vector.broadcast %cst_5 : f32 to vector<8x128xf32>
    %7 = arith.maximumf %5, %6 : vector<8x128xf32>
    %c0_6 = arith.constant 0 : index
    %c0_7 = arith.constant 0 : index
    %8 = vector.load %arg5[%c0_6, %c0_7] : memref<128x128xf32, #tpu.memory_space<vmem>>, vector<128x128xf32>
    %cst_8 = arith.constant dense<0.000000e+00> : vector<8x128xf32>
    %9 = tpu.matmul %7, %8, %cst_8 {dimension_numbers = #tpu.dot_dimension_numbers<[1], [0], [0], [1], [0, 0, 1, 1], [], []>, precision = #tpu.contract_precision<fp32>} : vector<8x128xf32>, vector<128x128xf32>, vector<8x128xf32> -> vector<8x128xf32>
    %c0_9 = arith.constant 0 : index
    %c0_10 = arith.constant 0 : index
    %10 = vector.load %arg6[%c0_9, %c0_10] : memref<1x128xf32, #tpu.memory_space<vmem>>, vector<1x128xf32>
    %11 = vector.broadcast %10 : vector<1x128xf32> to vector<8x128xf32>
    %12 = arith.addf %9, %11 : vector<8x128xf32>
    %c0_11 = arith.constant 0 : index
    %c0_12 = arith.constant 0 : index
    %13 = vector.load %arg7[%c0_11, %c0_12] : memref<8x128xf32, #tpu.memory_space<vmem>>, vector<8x128xf32>
    tpu.vector_store %arg7[%c0_11, %c0_12], %12 {strides = array<i32>} : memref<8x128xf32, #tpu.memory_space<vmem>>, vector<8x128xf32>,
    return
  }
  func.func @transform_0(%arg0: i32, %arg1: i32) -> (i32, i32) {
    %c0_i32 = arith.constant 0 : i32
    %c0_i32_0 = arith.constant 0 : i32
    return %arg0, %c0_i32 : i32, i32
  }
  func.func @transform_1(%arg0: i32, %arg1: i32) -> (i32, i32) {
    %c0_i32 = arith.constant 0 : i32
    %c0_i32_0 = arith.constant 0 : i32
    %c0_i32_1 = arith.constant 0 : i32
    return %c0_i32, %c0_i32_0 : i32, i32
  }
  func.func @transform_2(%arg0: i32, %arg1: i32) -> (i32, i32) {
    %c0_i32 = arith.constant 0 : i32
    %c0_i32_0 = arith.constant 0 : i32
    %c0_i32_1 = arith.constant 0 : i32
    return %c0_i32, %c0_i32_0 : i32, i32
  }
  func.func @transform_3(%arg0: i32, %arg1: i32) -> (i32, i32) {
    %c0_i32 = arith.constant 0 : i32
    %c0_i32_0 = arith.constant 0 : i32
    return %c0_i32, %arg1 : i32, i32
  }
  func.func @transform_4(%arg0: i32, %arg1: i32) -> (i32, i32) {
    %c0_i32 = arith.constant 0 : i32
    %c0_i32_0 = arith.constant 0 : i32
    return %c0_i32, %arg1 : i32, i32
  }
  func.func @transform_5(%arg0: i32, %arg1: i32) -> (i32, i32) {
    %c0_i32 = arith.constant 0 : i32
    return %arg0, %arg1 : i32, i32
  }
}

</mosaic_0001>

<bundles_post_ra>
// kernel: tpu_custom_call.1
= control target key start
LH: loop header
LB: loop body
LE: loop exit
PB: predicated region body
PF: predicated region fallthrough
CT: control target
= control target key end

     0   :  { %10 = vsyncpa [#allocation3], 0  ;;  %s2240_s0 = inlined_call_operand.hbm [shape: f32[8,16], index: 0, kind: input, shape index: {}]   ;;  %s2241_s1 = inlined_call_operand.hbm [shape: f32[16,128], index: 1, kind: input, shape index: {}]   ;;  %s2242_s2 = inlined_call_operand.vmem [shape: f32[1,128], index: 2, kind: input, shape index: {}]   ;;  %s2243_s3 = inlined_call_operand.hbm [shape: f32[128,128], index: 3, kind: input, shape index: {}]   ;;  %s2244_s4 = inlined_call_operand.vmem [shape: f32[1,128], index: 4, kind: input, shape index: {}]   ;;  %s2245_s5 = inlined_call_operand.hbm [shape: f32[8,128], index: 5, kind: output, shape index: {}]  }
   0x1   :  { %11 = vsyncpa [#allocation6], 0 }
   0x2   :  { %12 = vsyncpa [#allocation4], 0  ;;  %s1874_s18 = smov [#allocation5]   ;;  %s1780_s22 = scalar_lea.hbm %s2241_s1, 256 }
   0x3   :  { %s28_s19 = sshll.u32 %s1874_s18, 4  ;;  %p1781_p0 = scmp.ne.s32.totalorder %s2241_s1, %s1780_s22  ;;  %s29_s19 = int_to_ptr.vmem [resolvable:$true] %s28_s19 }
   0x4   :  { %p1784_p1 = scmp.lt.u32.totalorder %s1780_s22, %s2241_s1 }
   0x6   :  { %p1786_p2 = pnand %p1784_p1, %p1781_p0 }
   0x8   :  { %1789 = shalt.err (!%p1786_p2)
}
   0x9   :  { %s1790_s27 = scalar_lea.vmem %s29_s19, 256  ;;  %p1795_p4 = scmp.lt.s32.totalorder %s29_s19, %s29_s19 }
   0xa   :  { %p1791_p3 = scmp.ne.s32.totalorder %s29_s19, %s1790_s27  ;;  %p1796_p5 = scmp.lt.s32.totalorder %s1790_s27, %s1790_s27 }
   0xc   :  { %p1797_p6 = por %p1796_p5, %p1795_p4 }
   0xe   :  { %p1798_p7 = pnand %p1797_p6, %p1791_p3 }
  0x10   :  { %1801 = shalt.err (!%p1798_p7)
}
  0x11   :  { %s1875_s28 = smov 128   ;;  %s1876_s29 = smov 8  }
  0x12   :  { %34 = dma.hbm_to_vmem [thread:$0]  %s2241_s1, 256, %s29_s19, [#allocation6], %s1875_s28, %s1875_s28, %s1876_s29  }
  0x13   :  { %s1877_s7 = smov [#allocation2]   ;;  %s1878_s9 = smov [#allocation7]  }
  0x14   :  { %s19_s8 = sshll.u32 %s1877_s7, 4  ;;  %s42_s10 = sshll.u32 %s1878_s9, 4  ;;  %s20_s8 = int_to_ptr.vmem [resolvable:$true] %s19_s8  ;;  %s43_s10 = int_to_ptr.vmem [resolvable:$true] %s42_s10 }
  0x15   :  { %s1802_s13 = scalar_lea.hbm %s2240_s0, 128 }
  0x16   :  { %p1803_p8 = scmp.ne.s32.totalorder %s2240_s0, %s1802_s13  ;;  %p1806_p9 = scmp.lt.u32.totalorder %s1802_s13, %s2240_s0 }
  0x18   :  { %p1808_p10 = pnand %p1806_p9, %p1803_p8 }
  0x1a   :  { %1811 = shalt.err (!%p1808_p10)
}
  0x1b   :  { %s1812_s1 = scalar_lea.vmem %s20_s8, 128  ;;  %p1817_p12 = scmp.lt.s32.totalorder %s20_s8, %s20_s8 }
  0x1c   :  { %p1813_p11 = scmp.ne.s32.totalorder %s20_s8, %s1812_s1  ;;  %p1818_p13 = scmp.lt.s32.totalorder %s1812_s1, %s1812_s1 }
  0x1e   :  { %p1819_p0 = por %p1818_p13, %p1817_p12 }
  0x20   :  { %p1820_p1 = pnand %p1819_p0, %p1813_p11 }
  0x22   :  { %1823 = shalt.err (!%p1820_p1)
}
  0x23   :  { %22 = dma.hbm_to_vmem [thread:$0]  %s2240_s0, 128, %s20_s8, [#allocation3]  }
  0x24   :  { %s1824_s22 = scalar_lea.hbm %s2243_s3, 2048 }
  0x25   :  { %p1825_p2 = scmp.ne.s32.totalorder %s2243_s3, %s1824_s22  ;;  %p1828_p3 = scmp.lt.u32.totalorder %s1824_s22, %s2243_s3 }
  0x27   :  { %p1830_p4 = pnand %p1828_p3, %p1825_p2 }
  0x29   :  { %1833 = shalt.err (!%p1830_p4)
}
  0x2a   :  { %s1834_s27 = scalar_lea.vmem %s43_s10, 2048  ;;  %p1839_p6 = scmp.lt.s32.totalorder %s43_s10, %s43_s10 }
  0x2b   :  { %p1835_p5 = scmp.ne.s32.totalorder %s43_s10, %s1834_s27  ;;  %p1840_p7 = scmp.lt.s32.totalorder %s1834_s27, %s1834_s27 }
  0x2d   :  { %p1841_p8 = por %p1840_p7, %p1839_p6 }
  0x2f   :  { %p1842_p9 = pnand %p1841_p8, %p1835_p5 }
  0x31   :  { %1845 = shalt.err (!%p1842_p9)
}
  0x32   :  { %48 = dma.hbm_to_vmem [thread:$0]  %s2243_s3, 2048, %s43_s10, [#allocation6], %s1875_s28, %s1875_s28, %s1876_s29  }
  0x33   :  { %1868 = dma.done.wait [#allocation3], 128  }
  0x34   :  { %1869 = vsyncadd [#allocation3], 4294967168 }
  0x35   :  { %1870 = dma.done.wait [#allocation6], 2304  }
  0x36   :  { %1871 = vsyncadd [#allocation6], 4294964992  ;;  %v1879_v0 = vmov 0.0|0.0   ;;  %vm1880_vm0 = vmmov 0   ;;  %v1881_v1 = vmov 0.0   ;;  %vm70_vm1 = vcmask 130048  }
  0x37   :  { %1598 = vmatprep.subr.bf16.mxu0 %v1879_v0  ;;  %1362 = vmatprep.mubr.msk.f32.mxu0 %vm1880_vm0, %v1881_v1  ;;  %v61_v2 = vld [vmem:[#allocation5] sm:$0xff]  ;;  %v62_v3 = vld [vmem:[#allocation5 + $0x8] sm:$0xff]  ;;  %v60_v4 = vld [vmem:[#allocation2] sm:$0xff]  ;;  %s1882_s6 = smov [#allocation8]  }
  0x38   :  { %1589 = vmatprep.subr.bf16.mxu1 %v1879_v0  ;;  %1341 = vmatprep.mubr.msk.f32.mxu1 %vm1880_vm0, %v1881_v1  ;;  %v75_v5 = vand.u32 4294901760, %v61_v2  ;;  %v78_v6 = vand.u32 4294901760, %v62_v3  ;;  %v72_v7 = vsel %vm70_vm1, %v60_v4, 0  ;;  %v534_v8 = vld [vmem:[#allocation7] sm:$0xff]  ;;  %v535_v9 = vld [vmem:[#allocation7 + $0x8] sm:$0xff]  ;;  %v1961_v10 = vld [vmem:[#allocation7 + $0x10] sm:$0xff] }
  0x39   :  { %v141_v11 = vand.u32 4294901760, %v72_v7  ;;  %v558_v12 = vand.u32 4294901760, %v534_v8  ;;  %v561_v13 = vand.u32 4294901760, %v535_v9  ;;  %v537_v14 = vld [vmem:[#allocation7 + $0x18] sm:$0xff]  ;;  %v564_v18 = vand.u32 4294901760, %v1961_v10  ;;  %v538_v19 = vld [vmem:[#allocation7 + $0x20] sm:$0xff] }
  0x3a   :  { %v1590_v15 = vpack.c.bf16 %v78_v6, %v75_v5  ;;  %v153_v16 = vsub.f32 %v61_v2, %v75_v5  ;;  %v160_v17 = vsub.f32 %v62_v3, %v78_v6  ;;  %v567_v23 = vand.u32 4294901760, %v537_v14  ;;  %v539_v24 = vld [vmem:[#allocation7 + $0x28] sm:$0xff]  ;;  %v540_v27 = vld [vmem:[#allocation7 + $0x30] sm:$0xff]  ;;  %v541_v28 = vld [vmem:[#allocation7 + $0x38] sm:$0xff]  ;;  %s1205_s7 = sshll.u32 %s1882_s6, 4  ;;  %s1206_s7 = int_to_ptr.vmem [resolvable:$true] %s1205_s7 }
  0x3b   :  { %v142_v20 = vsub.f32 %v72_v7, %v141_v11  ;;  %v1964_v21 = vsub.f32 %v534_v8, %v558_v12  ;;  %v1966_v22 = vsub.f32 %v535_v9, %v561_v13  ;;  %v1971_v30 = vsub.f32 %v1961_v10, %v564_v18  ;;  %v542_v53 = vld [vmem:[#allocation7 + $0x40] sm:$0xff]  ;;  %v543_v54 = vld [vmem:[#allocation7 + $0x48] sm:$0xff]  ;;  %v544_v58 = vld [vmem:[#allocation7 + $0x50] sm:$0xff]  ;;  %s1846_s8 = scalar_lea.vmem %s1206_s7, 128  ;;  %p1851_p11 = scmp.lt.s32.totalorder %s1206_s7, %s1206_s7 }
  0x3c   :  { %1600 = vmatpush3.bf16.msra.mxu0 %v1590_v15  ;;  %1591 = vmatpush3.bf16.msra.mxu1 %v1590_v15  ;;  %v154_v25 = vand.u32 4294901760, %v153_v16  ;;  %v161_v26 = vand.u32 4294901760, %v160_v17  ;;  %v1973_v31 = vsub.f32 %v537_v14, %v567_v23  ;;  %v570_v32 = vand.u32 4294901760, %v538_v19  ;;  %v545_v59 = vld [vmem:[#allocation7 + $0x58] sm:$0xff]  ;;  %v546_v3 = vld [vmem:[#allocation7 + $0x60] sm:$0xff]  ;;  %v547_v4 = vld [vmem:[#allocation7 + $0x68] sm:$0xff]  ;;  %p1847_p10 = scmp.ne.s32.totalorder %s1206_s7, %s1846_s8  ;;  %p1852_p12 = scmp.lt.s32.totalorder %s1846_s8, %s1846_s8 }
  0x3d   :  { %v143_v29 = vand.u32 4294901760, %v142_v20  ;;  %1592 = vmatprep.subr.bf16.mxu1 %v1879_v0  ;;  %1601 = vmatprep.subr.bf16.mxu0 %v1879_v0  ;;  %v573_v36 = vand.u32 4294901760, %v539_v24  ;;  %v576_v39 = vand.u32 4294901760, %v540_v27  ;;  %v579_v40 = vand.u32 4294901760, %v541_v28  ;;  %v548_v8 = vld [vmem:[#allocation7 + $0x70] sm:$0xff]  ;;  %v549_v9 = vld [vmem:[#allocation7 + $0x78] sm:$0xff] }
  0x3e   :  { %v155_v33 = vsub.f32 %v153_v16, %v154_v25  ;;  %v162_v34 = vsub.f32 %v160_v17, %v161_v26  ;;  %v1602_v35 = vpack.c.bf16 %v161_v26, %v154_v25  ;;  %v1975_v38 = vsub.f32 %v538_v19, %v570_v32  ;;  %p1853_p13 = por %p1852_p12, %p1851_p11 }
  0x3f   :  { %1363 = vmatmul.mubr.f32.vlgmr.msra.gmra.mrb[0].mxu0 %v143_v29  ;;  %v144_v37 = vsub.f32 %v142_v20, %v143_v29  ;;  %v1979_v43 = vsub.f32 %v539_v24, %v573_v36  ;;  %v1982_v45 = vsub.f32 %v540_v27, %v576_v39  ;;  %v1984_v46 = vsub.f32 %v541_v28, %v579_v40 }
  0x40   :  { %v156_v41 = vand.u32 4294901760, %v155_v33  ;;  %v163_v42 = vand.u32 4294901760, %v162_v34  ;;  %1603 = vmatpush3.bf16.msra.mxu0 %v1602_v35  ;;  %1369 = vmatprep.mubr.msk.f32.mxu0 %vm1880_vm0, %v1881_v1  ;;  %v1596_v48 = vpack.c.bf16 %v160_v17, %v153_v16  ;;  %v1995_v49 = vpack.c.bf16 %v561_v13, %v558_v12  ;;  %p1854_p0 = pnand %p1853_p13, %p1847_p10 }
  0x41   :  { %v145_v44 = vand.u32 4294901760, %v144_v37  ;;  %1604 = vmatprep.subr.bf16.mxu0 %v1879_v0  ;;  %v2001_v50 = vpack.c.bf16 %v567_v23, %v564_v18  ;;  %v2007_v51 = vpack.c.bf16 %v573_v36, %v570_v32  ;;  %v2015_v52 = vpack.c.bf16 %v579_v40, %v576_v39 }
  0x42   :  { %v1593_v47 = vpack.c.bf16 %v163_v42, %v156_v41  ;;  %v582_v55 = vand.u32 4294901760, %v542_v53  ;;  %v585_v56 = vand.u32 4294901760, %v543_v54  ;;  %v588_v62 = vand.u32 4294901760, %v544_v58 }
  0x43   :  { %1342 = vmatmul.mubr.f32.vlgmr.msra.gmra.mrb[0].mxu1 %v145_v44  ;;  %v591_v63 = vand.u32 4294901760, %v545_v59  ;;  %v594_v5 = vand.u32 4294901760, %v546_v3  ;;  %v597_v6 = vand.u32 4294901760, %v547_v4  ;;  %v600_v10 = vand.u32 4294901760, %v548_v8 }
  0x44   :  { %1594 = vmatpush3.bf16.msra.mxu1 %v1593_v47  ;;  %1348 = vmatprep.mubr.msk.f32.mxu1 %vm1880_vm0, %v1881_v1  ;;  %v2023_v57 = vpack.c.bf16 %v585_v56, %v582_v55  ;;  %v2025_v60 = vsub.f32 %v542_v53, %v582_v55  ;;  %v2027_v61 = vsub.f32 %v543_v54, %v585_v56  ;;  %v651_v19 = vand.u32 4294901760, %v1964_v21 }
  0x45   :  { %1595 = vmatprep.subr.bf16.mxu1 %v1879_v0  ;;  %v2033_v2 = vpack.c.bf16 %v591_v63, %v588_v62  ;;  %v2039_v7 = vpack.c.bf16 %v597_v6, %v594_v5  ;;  %v2047_v13 = vsub.f32 %v544_v58, %v588_v62  ;;  %v2049_v14 = vsub.f32 %v545_v59, %v591_v63 }
  0x46   :  { %v2053_v16 = vsub.f32 %v547_v4, %v597_v6  ;;  %v2056_v17 = vsub.f32 %v548_v8, %v600_v10  ;;  %v652_v24 = vsub.f32 %v1964_v21, %v651_v19  ;;  %v665_v28 = vand.u32 4294901760, %v1971_v30 }
  0x47   :  { %1370 = vmatmul.mubr.f32.vlgmr.msra.gmra.mrb[0].mxu0 %v141_v11  ;;  %v672_v29 = vand.u32 4294901760, %v1973_v31  ;;  %v679_v39 = vand.u32 4294901760, %v1975_v38  ;;  %v686_v40 = vand.u32 4294901760, %v1979_v43  ;;  %v693_v54 = vand.u32 4294901760, %v1982_v45 }
  0x48   :  { %1606 = vmatpush3.bf16.msra.mxu0 %v1590_v15  ;;  %1376 = vmatprep.mubr.msk.f32.mxu0 %vm1880_vm0, %v1881_v1  ;;  %v2051_v15 = vsub.f32 %v546_v3, %v594_v5  ;;  %v653_v26 = vand.u32 4294901760, %v652_v24  ;;  %v666_v34 = vsub.f32 %v1971_v30, %v665_v28  ;;  %v700_v55 = vand.u32 4294901760, %v1984_v46 }
  0x49   :  { %1607 = vmatprep.subr.bf16.mxu0 %v1879_v0  ;;  %v2073_v33 = vpack.c.bf16 %v672_v29, %v665_v28  ;;  %v673_v35 = vsub.f32 %v1973_v31, %v672_v29  ;;  %v2081_v42 = vpack.c.bf16 %v686_v40, %v679_v39  ;;  %v680_v44 = vsub.f32 %v1975_v38, %v679_v39 }
  0x4a   :  { %v667_v36 = vand.u32 4294901760, %v666_v34  ;;  %v687_v47 = vsub.f32 %v1979_v43, %v686_v40  ;;  %v2089_v58 = vpack.c.bf16 %v700_v55, %v693_v54  ;;  %v694_v59 = vsub.f32 %v1982_v45, %v693_v54 }
  0x4b   :  { %1349 = vmatmul.mubr.f32.vlgmr.msra.gmra.mrb[0].mxu1 %v141_v11  ;;  %v674_v37 = vand.u32 4294901760, %v673_v35  ;;  %v701_v62 = vsub.f32 %v1984_v46, %v700_v55  ;;  %v707_v4 = vand.u32 4294901760, %v2025_v60  ;;  %v714_v5 = vand.u32 4294901760, %v2027_v61 }
  0x4c   :  { %1597 = vmatpush3.bf16.msra.mxu1 %v1596_v48  ;;  %1355 = vmatprep.mubr.msk.f32.mxu1 %vm1880_vm0, %v1881_v1  ;;  %v681_v48 = vand.u32 4294901760, %v680_v44  ;;  %v688_v53 = vand.u32 4294901760, %v687_v47  ;;  %v695_v63 = vand.u32 4294901760, %v694_v59  ;;  %v728_v24 = vand.u32 4294901760, %v2049_v14 }
  0x4d   :  { %1679 = vmatprep.subr.bf16.mxu1 %v1879_v0  ;;  %v2079_v41 = vpack.c.bf16 %v674_v37, %v667_v36  ;;  %v702_v3 = vand.u32 4294901760, %v701_v62  ;;  %v2097_v8 = vpack.c.bf16 %v714_v5, %v707_v4  ;;  %v735_v35 = vand.u32 4294901760, %v2051_v15 }
  0x4e   :  { %v2087_v56 = vpack.c.bf16 %v688_v53, %v681_v48  ;;  %v729_v28 = vsub.f32 %v2049_v14, %v728_v24  ;;  %v742_v36 = vand.u32 4294901760, %v2053_v16  ;;  %v749_v53 = vand.u32 4294901760, %v2056_v17 }
  0x4f   :  { %1377 = vmatmul.mubr.f32.vlgmr.msra.gmra.mrb[0].mxu0 %v141_v11  ;;  %v603_v11 = vand.u32 4294901760, %v549_v9  ;;  %v2095_v6 = vpack.c.bf16 %v702_v3, %v695_v63  ;;  %v736_v40 = vsub.f32 %v2051_v15, %v735_v35 }
  0x50   :  { %1609 = vmatpush3.bf16.msra.mxu0 %v1995_v49  ;;  %1411 = vmatprep.mubr.msk.f32.mxu0 %vm1880_vm0, %v1881_v1  ;;  %v730_v34 = vand.u32 4294901760, %v729_v28  ;;  %v1722_v39 = vpack.c.bf16 %v742_v36, %v735_v35  ;;  %v743_v44 = vsub.f32 %v2053_v16, %v742_v36  ;;  %v750_v62 = vsub.f32 %v2056_v17, %v749_v53 }
  0x51   :  { %1610 = vmatprep.subr.bf16.mxu0 %v1879_v0  ;;  %v2045_v12 = vpack.c.bf16 %v603_v11, %v600_v10  ;;  %v2058_v18 = vsub.f32 %v549_v9, %v603_v11  ;;  %v708_v9 = vsub.f32 %v2025_v60, %v707_v4  ;;  %v715_v10 = vsub.f32 %v2027_v61, %v714_v5 }
  0x52   :  { %v737_v47 = vand.u32 4294901760, %v736_v40  ;;  %v744_v48 = vand.u32 4294901760, %v743_v44  ;;  %v751_v3 = vand.u32 4294901760, %v750_v62 }
  0x53   :  { %1356 = vmatmul.mubr.f32.vlgmr.msra.gmra.mrb[0].mxu1 %v142_v20  ;;  %v658_v20 = vand.u32 4294901760, %v1966_v22  ;;  %v709_v11 = vand.u32 4294901760, %v708_v9  ;;  %v756_v54 = vand.u32 4294901760, %v2058_v18  ;;  %v1656_v9 = vpack.c.bf16 %v1966_v22, %v1964_v21 }
  0x54   :  { %1681 = vmatpush3.bf16.msra.mxu1 %v1995_v49  ;;  %1612 = vmatpush3.bf16.msra.mxu0 %v2001_v50  ;;  %v1650_v55 = vpack.c.bf16 %v744_v48, %v737_v47  ;;  %v1677_v21 = vpack.c.bf16 %v2058_v18, %v2056_v17 }
  0x55   :  { %1682 = vmatprep.subr.bf16.mxu1 %v1879_v0  ;;  %1613 = vmatprep.subr.bf16.mxu0 %v1879_v0  ;;  %v2065_v23 = vpack.c.bf16 %v658_v20, %v651_v19  ;;  %v659_v25 = vsub.f32 %v1966_v22, %v658_v20  ;;  %v716_v19 = vand.u32 4294901760, %v715_v10  ;;  %v721_v20 = vand.u32 4294901760, %v2047_v13 }
  0x56   :  { %1516 = vmatprep.mubr.msk.f32.mxu1 %vm1880_vm0, %v1881_v1  ;;  %v1725_v59 = vpack.c.bf16 %v756_v54, %v749_v53  ;;  %v757_v63 = vsub.f32 %v2058_v18, %v756_v54  ;;  %v1659_v10 = vpack.c.bf16 %v1973_v31, %v1971_v30  ;;  %v1216_v31 = vld [vmem:[%s2244_s4] ss:$0 sm:$0xff] }
  0x57   :  { %v660_v27 = vand.u32 4294901760, %v659_v25  ;;  %v2103_v25 = vpack.c.bf16 %v716_v19, %v709_v11  ;;  %v1662_v11 = vpack.c.bf16 %v1979_v43, %v1975_v38  ;;  %v1665_v19 = vpack.c.bf16 %v1984_v46, %v1982_v45 }
  0x58   :  { %1684 = vmatpush3.bf16.msra.mxu1 %v2001_v50  ;;  %1615 = vmatpush3.bf16.msra.mxu0 %v2007_v51  ;;  %v758_v4 = vand.u32 4294901760, %v757_v63 }
  0x59   :  { %1685 = vmatprep.subr.bf16.mxu1 %v1879_v0  ;;  %1616 = vmatprep.subr.bf16.mxu0 %v1879_v0  ;;  %v2071_v32 = vpack.c.bf16 %v660_v27, %v653_v26  ;;  %v2105_v26 = vpack.c.bf16 %v728_v24, %v721_v20  ;;  %v722_v27 = vsub.f32 %v2047_v13, %v721_v20 }
  0x5a   :  { %v1653_v5 = vpack.c.bf16 %v758_v4, %v751_v3  ;;  %v1668_v20 = vpack.c.bf16 %v2027_v61, %v2025_v60  ;;  %v1671_v24 = vpack.c.bf16 %v2049_v14, %v2047_v13 }
  0x5b   :  { %v723_v29 = vand.u32 4294901760, %v722_v27  ;;  %v1674_v27 = vpack.c.bf16 %v2053_v16, %v2051_v15 }
  0x5c   :  { %1687 = vmatpush3.bf16.msra.mxu1 %v2007_v51  ;;  %1618 = vmatpush3.bf16.msra.mxu0 %v2015_v52 }
  0x5d   :  { %1688 = vmatprep.subr.bf16.mxu1 %v1879_v0  ;;  %1619 = vmatprep.subr.bf16.mxu0 %v1879_v0  ;;  %v1647_v37 = vpack.c.bf16 %v730_v34, %v723_v29  ;;  %v1215_v29 = vld [vmem:[%s2242_s2] ss:$0 sm:$0xff] }
  0x60   :  { %1690 = vmatpush3.bf16.msra.mxu1 %v2015_v52  ;;  %1621 = vmatpush3.bf16.msra.mxu0 %v2023_v57 }
  0x61   :  { %1691 = vmatprep.subr.bf16.mxu1 %v1879_v0  ;;  %1622 = vmatprep.subr.bf16.mxu0 %v1879_v0 }
  0x64   :  { %1693 = vmatpush3.bf16.msra.mxu1 %v2023_v57  ;;  %1624 = vmatpush3.bf16.msra.mxu0 %v2033_v2 }
  0x65   :  { %1694 = vmatprep.subr.bf16.mxu1 %v1879_v0  ;;  %1625 = vmatprep.subr.bf16.mxu0 %v1879_v0 }
  0x68   :  { %1696 = vmatpush3.bf16.msra.mxu1 %v2033_v2  ;;  %1627 = vmatpush3.bf16.msra.mxu0 %v2039_v7 }
  0x69   :  { %1697 = vmatprep.subr.bf16.mxu1 %v1879_v0  ;;  %1628 = vmatprep.subr.bf16.mxu0 %v1879_v0 }
  0x6c   :  { %1699 = vmatpush3.bf16.msra.mxu1 %v2039_v7  ;;  %1630 = vmatpush3.bf16.msra.mxu0 %v2045_v12 }
  0x6d   :  { %1700 = vmatprep.subr.bf16.mxu1 %v1879_v0  ;;  %1631 = vmatprep.subr.bf16.mxu0 %v1879_v0 }
  0x70   :  { %1702 = vmatpush3.bf16.msra.mxu1 %v2045_v12 }
  0x71   :  { %1703 = vmatprep.subr.bf16.mxu1 %v1879_v0 }
 0x122   :  { %v529_v22 = vpop.f32.mrb[0].mxu0 }
 0x123   :  { %v1378_v28 = vpop.f32.mrb[1].mxu0 }
 0x126   :  { %v304_v34 = vpop.f32.mrb[0].mxu1 }
 0x127   :  { %v1751_v35 = vadd.f32 %v1215_v29, %v304_v34  ;;  %v1357_v36 = vpop.f32.mrb[1].mxu1 }
 0x129   :  { %v1752_v40 = vadd.f32 %v1751_v35, %v529_v22 }
 0x12b   :  { %v533_v44 = vmax.f32 %v1752_v40, 0.0 }
 0x12d   :  { %v2136_v47 = vand.u32 4294901760, %v533_v44 }
 0x12f   :  { %v2139_v48 = vsub.f32 %v533_v44, %v2136_v47 }
 0x131   :  { %v640_v53 = vand.u32 4294901760, %v2139_v48 }
 0x133   :  { %1517 = vmatmul.mubr.f32.vlgmr.msra.gmra.mrb[2].mxu1 %v640_v53  ;;  %v641_v54 = vsub.f32 %v2139_v48, %v640_v53 }
 0x134   :  { %1705 = vmatpush3.bf16.msra.mxu1 %v2065_v23  ;;  %1551 = vmatprep.mubr.msk.f32.mxu1 %vm1880_vm0, %v1881_v1 }
 0x135   :  { %1706 = vmatprep.subr.bf16.mxu1 %v1879_v0  ;;  %v642_v62 = vand.u32 4294901760, %v641_v54 }
 0x137   :  { %1412 = vmatmul.mubr.f32.vlgmr.msra.gmra.mrb[2].mxu0 %v642_v62 }
 0x138   :  { %1633 = vmatpush3.bf16.msra.mxu0 %v2071_v32  ;;  %1708 = vmatpush3.bf16.msra.mxu1 %v2073_v33 }
 0x139   :  { %1634 = vmatprep.subr.bf16.mxu0 %v1879_v0  ;;  %1709 = vmatprep.subr.bf16.mxu1 %v1879_v0 }
 0x13a   :  { %1446 = vmatprep.mubr.msk.f32.mxu0 %vm1880_vm0, %v1881_v1 }
 0x13c   :  { %1636 = vmatpush3.bf16.msra.mxu0 %v2079_v41  ;;  %1711 = vmatpush3.bf16.msra.mxu1 %v2081_v42 }
 0x13d   :  { %1637 = vmatprep.subr.bf16.mxu0 %v1879_v0  ;;  %1712 = vmatprep.subr.bf16.mxu1 %v1879_v0 }
 0x140   :  { %1639 = vmatpush3.bf16.msra.mxu0 %v2087_v56  ;;  %1714 = vmatpush3.bf16.msra.mxu1 %v2089_v58 }
 0x141   :  { %1640 = vmatprep.subr.bf16.mxu0 %v1879_v0  ;;  %1715 = vmatprep.subr.bf16.mxu1 %v1879_v0 }
 0x144   :  { %1642 = vmatpush3.bf16.msra.mxu0 %v2095_v6  ;;  %1717 = vmatpush3.bf16.msra.mxu1 %v2097_v8 }
 0x145   :  { %1643 = vmatprep.subr.bf16.mxu0 %v1879_v0  ;;  %1718 = vmatprep.subr.bf16.mxu1 %v1879_v0 }
 0x148   :  { %1645 = vmatpush3.bf16.msra.mxu0 %v2103_v25  ;;  %1720 = vmatpush3.bf16.msra.mxu1 %v2105_v26 }
 0x149   :  { %1646 = vmatprep.subr.bf16.mxu0 %v1879_v0  ;;  %1721 = vmatprep.subr.bf16.mxu1 %v1879_v0 }
 0x14c   :  { %1648 = vmatpush3.bf16.msra.mxu0 %v1647_v37  ;;  %1723 = vmatpush3.bf16.msra.mxu1 %v1722_v39 }
 0x14d   :  { %1649 = vmatprep.subr.bf16.mxu0 %v1879_v0  ;;  %1724 = vmatprep.subr.bf16.mxu1 %v1879_v0 }
 0x150   :  { %1651 = vmatpush3.bf16.msra.mxu0 %v1650_v55  ;;  %1726 = vmatpush3.bf16.msra.mxu1 %v1725_v59 }
 0x151   :  { %1652 = vmatprep.subr.bf16.mxu0 %v1879_v0  ;;  %1727 = vmatprep.subr.bf16.mxu1 %v1879_v0 }
 0x153   :  { %1552 = vmatmul.mubr.f32.vlgmr.msra.gmra.mrb[2].mxu1 %v2136_v47 }
 0x154   :  { %1654 = vmatpush3.bf16.msra.mxu0 %v1653_v5  ;;  %1729 = vmatpush3.bf16.msra.mxu1 %v1995_v49 }
 0x155   :  { %1655 = vmatprep.subr.bf16.mxu0 %v1879_v0  ;;  %1730 = vmatprep.subr.bf16.mxu1 %v1879_v0 }
 0x156   :  { %1586 = vmatprep.mubr.msk.f32.mxu1 %vm1880_vm0, %v1881_v1 }
 0x157   :  { %1447 = vmatmul.mubr.f32.vlgmr.msra.gmra.mrb[2].mxu0 %v2136_v47 }
 0x158   :  { %1657 = vmatpush3.bf16.msra.mxu0 %v1656_v9  ;;  %1732 = vmatpush3.bf16.msra.mxu1 %v2001_v50 }
 0x159   :  { %1658 = vmatprep.subr.bf16.mxu0 %v1879_v0  ;;  %1733 = vmatprep.subr.bf16.mxu1 %v1879_v0 }
 0x15a   :  { %1481 = vmatprep.mubr.msk.f32.mxu0 %vm1880_vm0, %v1881_v1 }
 0x15c   :  { %1660 = vmatpush3.bf16.msra.mxu0 %v1659_v10  ;;  %1735 = vmatpush3.bf16.msra.mxu1 %v2007_v51 }
 0x15d   :  { %1661 = vmatprep.subr.bf16.mxu0 %v1879_v0  ;;  %1736 = vmatprep.subr.bf16.mxu1 %v1879_v0 }
 0x160   :  { %1663 = vmatpush3.bf16.msra.mxu0 %v1662_v11  ;;  %1738 = vmatpush3.bf16.msra.mxu1 %v2015_v52 }
 0x161   :  { %1664 = vmatprep.subr.bf16.mxu0 %v1879_v0  ;;  %1739 = vmatprep.subr.bf16.mxu1 %v1879_v0 }
 0x164   :  { %1666 = vmatpush3.bf16.msra.mxu0 %v1665_v19  ;;  %1741 = vmatpush3.bf16.msra.mxu1 %v2023_v57 }
 0x165   :  { %1667 = vmatprep.subr.bf16.mxu0 %v1879_v0  ;;  %1742 = vmatprep.subr.bf16.mxu1 %v1879_v0 }
 0x168   :  { %1669 = vmatpush3.bf16.msra.mxu0 %v1668_v20  ;;  %1744 = vmatpush3.bf16.msra.mxu1 %v2033_v2 }
 0x169   :  { %1670 = vmatprep.subr.bf16.mxu0 %v1879_v0  ;;  %1745 = vmatprep.subr.bf16.mxu1 %v1879_v0 }
 0x16c   :  { %1672 = vmatpush3.bf16.msra.mxu0 %v1671_v24  ;;  %1747 = vmatpush3.bf16.msra.mxu1 %v2039_v7 }
 0x16d   :  { %1673 = vmatprep.subr.bf16.mxu0 %v1879_v0  ;;  %1748 = vmatprep.subr.bf16.mxu1 %v1879_v0 }
 0x170   :  { %1675 = vmatpush3.bf16.msra.mxu0 %v1674_v27  ;;  %1750 = vmatpush3.bf16.msra.mxu1 %v2045_v12 }
 0x171   :  { %1676 = vmatprep.subr.bf16.mxu0 %v1879_v0 }
 0x173   :  { %1587 = vmatmul.mubr.f32.vlgmr.msra.gmra.mrb[2].mxu1 %v2136_v47 }
 0x174   :  { %1678 = vmatpush3.bf16.msra.mxu0 %v1677_v21 }
 0x177   :  { %1482 = vmatmul.mubr.f32.vlgmr.msra.gmra.mrb[2].mxu0 %v2139_v48 }
 0x246   :  { %v1194_v1 = vpop.f32.mrb[2].mxu1 }
 0x247   :  { %v1588_v30 = vpop.f32.mrb[3].mxu1 }
 0x24a   :  { %v899_v38 = vpop.f32.mrb[2].mxu0 }
 0x24b   :  { %v1753_v43 = vadd.f32 %v1216_v31, %v899_v38  ;;  %v1483_v45 = vpop.f32.mrb[3].mxu0 }
 0x24d   :  { %v1754_v0 = vadd.f32 %v1753_v43, %v1194_v1 }
 0x24f   :  { %1198 = vst [vmem:[#allocation8] sm:$0xff] %v1754_v0 }
 0x250   :  { %1857 = shalt.err (!%p1854_p0)
}
 0x251   :  { %s1858_s11 = scalar_lea.hbm %s2245_s5, 128 }
 0x252   :  { %p1859_p1 = scmp.ne.s32.totalorder %s2245_s5, %s1858_s11  ;;  %p1862_p2 = scmp.lt.u32.totalorder %s1858_s11, %s2245_s5 }
 0x254   :  { %p1864_p3 = pnand %p1862_p2, %p1859_p1 }
 0x256   :  { %1867 = shalt.err (!%p1864_p3)
}
 0x257   :  { %1208 = dma.vmem_to_hbm [thread:$0]  %s1206_s7, 128, %s2245_s5, [#allocation4]  }
 0x258   :  { %1872 = dma.done.wait [#allocation4], 128  }
 0x259   :  { %1873 = vsyncadd [#allocation4], 4294967168 }
 0x25a   :  { %1212 = vsyncpa [#allocation3], 1 }
 0x25b   :  { %1213 = vsyncpa [#allocation6], 1 }
 0x25c   :  { %1214 = vsyncpa [#allocation4], 1 }

// kernel: tpu_custom_call.1
= control target key start
LH: loop header
LB: loop body
LE: loop exit
PB: predicated region body
PF: predicated region fallthrough
CT: control target
= control target key end

     0   :  { %10 = vsyncpa [#allocation3], 0  ;;  %s2240_s0 = inlined_call_operand.hbm [shape: f32[8,16], index: 0, kind: input, shape index: {}]   ;;  %s2241_s1 = inlined_call_operand.hbm [shape: f32[16,128], index: 1, kind: input, shape index: {}]   ;;  %s2242_s2 = inlined_call_operand.vmem [shape: f32[1,128], index: 2, kind: input, shape index: {}]   ;;  %s2243_s3 = inlined_call_operand.hbm [shape: f32[128,128], index: 3, kind: input, shape index: {}]   ;;  %s2244_s4 = inlined_call_operand.vmem [shape: f32[1,128], index: 4, kind: input, shape index: {}]   ;;  %s2245_s5 = inlined_call_operand.hbm [shape: f32[8,128], index: 5, kind: output, shape index: {}]  }
   0x1   :  { %11 = vsyncpa [#allocation6], 0 }
   0x2   :  { %12 = vsyncpa [#allocation4], 0  ;;  %s1874_s18 = smov [#allocation5]   ;;  %s1780_s22 = scalar_lea.hbm %s2241_s1, 256 }
   0x3   :  { %s28_s19 = sshll.u32 %s1874_s18, 4  ;;  %p1781_p0 = scmp.ne.s32.totalorder %s2241_s1, %s1780_s22  ;;  %s29_s19 = int_to_ptr.vmem [resolvable:$true] %s28_s19 }
   0x4   :  { %p1784_p1 = scmp.lt.u32.totalorder %s1780_s22, %s2241_s1 }
   0x6   :  { %p1786_p2 = pnand %p1784_p1, %p1781_p0 }
   0x8   :  { %1789 = shalt.err (!%p1786_p2)
}
   0x9   :  { %s1790_s27 = scalar_lea.vmem %s29_s19, 256  ;;  %p1795_p4 = scmp.lt.s32.totalorder %s29_s19, %s29_s19 }
   0xa   :  { %p1791_p3 = scmp.ne.s32.totalorder %s29_s19, %s1790_s27  ;;  %p1796_p5 = scmp.lt.s32.totalorder %s1790_s27, %s1790_s27 }
   0xc   :  { %p1797_p6 = por %p1796_p5, %p1795_p4 }
   0xe   :  { %p1798_p7 = pnand %p1797_p6, %p1791_p3 }
  0x10   :  { %1801 = shalt.err (!%p1798_p7)
}
  0x11   :  { %s1875_s28 = smov 128   ;;  %s1876_s29 = smov 8  }
  0x12   :  { %34 = dma.hbm_to_vmem [thread:$0]  %s2241_s1, 256, %s29_s19, [#allocation6], %s1875_s28, %s1875_s28, %s1876_s29  }
  0x13   :  { %s1877_s7 = smov [#allocation2]   ;;  %s1878_s9 = smov [#allocation7]  }
  0x14   :  { %s19_s8 = sshll.u32 %s1877_s7, 4  ;;  %s42_s10 = sshll.u32 %s1878_s9, 4  ;;  %s20_s8 = int_to_ptr.vmem [resolvable:$true] %s19_s8  ;;  %s43_s10 = int_to_ptr.vmem [resolvable:$true] %s42_s10 }
  0x15   :  { %s1802_s13 = scalar_lea.hbm %s2240_s0, 128 }
  0x16   :  { %p1803_p8 = scmp.ne.s32.totalorder %s2240_s0, %s1802_s13  ;;  %p1806_p9 = scmp.lt.u32.totalorder %s1802_s13, %s2240_s0 }
  0x18   :  { %p1808_p10 = pnand %p1806_p9, %p1803_p8 }
  0x1a   :  { %1811 = shalt.err (!%p1808_p10)
}
  0x1b   :  { %s1812_s1 = scalar_lea.vmem %s20_s8, 128  ;;  %p1817_p12 = scmp.lt.s32.totalorder %s20_s8, %s20_s8 }
  0x1c   :  { %p1813_p11 = scmp.ne.s32.totalorder %s20_s8, %s1812_s1  ;;  %p1818_p13 = scmp.lt.s32.totalorder %s1812_s1, %s1812_s1 }
  0x1e   :  { %p1819_p0 = por %p1818_p13, %p1817_p12 }
  0x20   :  { %p1820_p1 = pnand %p1819_p0, %p1813_p11 }
  0x22   :  { %1823 = shalt.err (!%p1820_p1)
}
  0x23   :  { %22 = dma.hbm_to_vmem [thread:$0]  %s2240_s0, 128, %s20_s8, [#allocation3]  }
  0x24   :  { %s1824_s22 = scalar_lea.hbm %s2243_s3, 2048 }
  0x25   :  { %p1825_p2 = scmp.ne.s32.totalorder %s2243_s3, %s1824_s22  ;;  %p1828_p3 = scmp.lt.u32.totalorder %s1824_s22, %s2243_s3 }
  0x27   :  { %p1830_p4 = pnand %p1828_p3, %p1825_p2 }
  0x29   :  { %1833 = shalt.err (!%p1830_p4)
}
  0x2a   :  { %s1834_s27 = scalar_lea.vmem %s43_s10, 2048  ;;  %p1839_p6 = scmp.lt.s32.totalorder %s43_s10, %s43_s10 }
  0x2b   :  { %p1835_p5 = scmp.ne.s32.totalorder %s43_s10, %s1834_s27  ;;  %p1840_p7 = scmp.lt.s32.totalorder %s1834_s27, %s1834_s27 }
  0x2d   :  { %p1841_p8 = por %p1840_p7, %p1839_p6 }
  0x2f   :  { %p1842_p9 = pnand %p1841_p8, %p1835_p5 }
  0x31   :  { %1845 = shalt.err (!%p1842_p9)
}
  0x32   :  { %48 = dma.hbm_to_vmem [thread:$0]  %s2243_s3, 2048, %s43_s10, [#allocation6], %s1875_s28, %s1875_s28, %s1876_s29  }
  0x33   :  { %1868 = dma.done.wait [#allocation3], 128  }
  0x34   :  { %1869 = vsyncadd [#allocation3], 4294967168 }
  0x35   :  { %1870 = dma.done.wait [#allocation6], 2304  }
  0x36   :  { %1871 = vsyncadd [#allocation6], 4294964992  ;;  %v1879_v0 = vmov 0.0|0.0   ;;  %vm1880_vm0 = vmmov 0   ;;  %v1881_v1 = vmov 0.0   ;;  %vm70_vm1 = vcmask 130048  }
  0x37   :  { %1598 = vmatprep.subr.bf16.mxu0 %v1879_v0  ;;  %1362 = vmatprep.mubr.msk.f32.mxu0 %vm1880_vm0, %v1881_v1  ;;  %v61_v2 = vld [vmem:[#allocation5] sm:$0xff]  ;;  %v62_v3 = vld [vmem:[#allocation5 + $0x8] sm:$0xff]  ;;  %v60_v4 = vld [vmem:[#allocation2] sm:$0xff]  ;;  %s1882_s6 = smov [#allocation8]  }
  0x38   :  { %1589 = vmatprep.subr.bf16.mxu1 %v1879_v0  ;;  %1341 = vmatprep.mubr.msk.f32.mxu1 %vm1880_vm0, %v1881_v1  ;;  %v75_v5 = vand.u32 4294901760, %v61_v2  ;;  %v78_v6 = vand.u32 4294901760, %v62_v3  ;;  %v72_v7 = vsel %vm70_vm1, %v60_v4, 0  ;;  %v534_v8 = vld [vmem:[#allocation7] sm:$0xff]  ;;  %v535_v9 = vld [vmem:[#allocation7 + $0x8] sm:$0xff]  ;;  %v1961_v10 = vld [vmem:[#allocation7 + $0x10] sm:$0xff] }
  0x39   :  { %v141_v11 = vand.u32 4294901760, %v72_v7  ;;  %v558_v12 = vand.u32 4294901760, %v534_v8  ;;  %v561_v13 = vand.u32 4294901760, %v535_v9  ;;  %v537_v14 = vld [vmem:[#allocation7 + $0x18] sm:$0xff]  ;;  %v564_v18 = vand.u32 4294901760, %v1961_v10  ;;  %v538_v19 = vld [vmem:[#allocation7 + $0x20] sm:$0xff] }
  0x3a   :  { %v1590_v15 = vpack.c.bf16 %v78_v6, %v75_v5  ;;  %v153_v16 = vsub.f32 %v61_v2, %v75_v5  ;;  %v160_v17 = vsub.f32 %v62_v3, %v78_v6  ;;  %v567_v23 = vand.u32 4294901760, %v537_v14  ;;  %v539_v24 = vld [vmem:[#allocation7 + $0x28] sm:$0xff]  ;;  %v540_v27 = vld [vmem:[#allocation7 + $0x30] sm:$0xff]  ;;  %v541_v28 = vld [vmem:[#allocation7 + $0x38] sm:$0xff]  ;;  %s1205_s7 = sshll.u32 %s1882_s6, 4  ;;  %s1206_s7 = int_to_ptr.vmem [resolvable:$true] %s1205_s7 }
  0x3b   :  { %v142_v20 = vsub.f32 %v72_v7, %v141_v11  ;;  %v1964_v21 = vsub.f32 %v534_v8, %v558_v12  ;;  %v1966_v22 = vsub.f32 %v535_v9, %v561_v13  ;;  %v1971_v30 = vsub.f32 %v1961_v10, %v564_v18  ;;  %v542_v53 = vld [vmem:[#allocation7 + $0x40] sm:$0xff]  ;;  %v543_v54 = vld [vmem:[#allocation7 + $0x48] sm:$0xff]  ;;  %v544_v58 = vld [vmem:[#allocation7 + $0x50] sm:$0xff]  ;;  %s1846_s8 = scalar_lea.vmem %s1206_s7, 128  ;;  %p1851_p11 = scmp.lt.s32.totalorder %s1206_s7, %s1206_s7 }
  0x3c   :  { %1600 = vmatpush3.bf16.msra.mxu0 %v1590_v15  ;;  %1591 = vmatpush3.bf16.msra.mxu1 %v1590_v15  ;;  %v154_v25 = vand.u32 4294901760, %v153_v16  ;;  %v161_v26 = vand.u32 4294901760, %v160_v17  ;;  %v1973_v31 = vsub.f32 %v537_v14, %v567_v23  ;;  %v570_v32 = vand.u32 4294901760, %v538_v19  ;;  %v545_v59 = vld [vmem:[#allocation7 + $0x58] sm:$0xff]  ;;  %v546_v3 = vld [vmem:[#allocation7 + $0x60] sm:$0xff]  ;;  %v547_v4 = vld [vmem:[#allocation7 + $0x68] sm:$0xff]  ;;  %p1847_p10 = scmp.ne.s32.totalorder %s1206_s7, %s1846_s8  ;;  %p1852_p12 = scmp.lt.s32.totalorder %s1846_s8, %s1846_s8 }
  0x3d   :  { %v143_v29 = vand.u32 4294901760, %v142_v20  ;;  %1592 = vmatprep.subr.bf16.mxu1 %v1879_v0  ;;  %1601 = vmatprep.subr.bf16.mxu0 %v1879_v0  ;;  %v573_v36 = vand.u32 4294901760, %v539_v24  ;;  %v576_v39 = vand.u32 4294901760, %v540_v27  ;;  %v579_v40 = vand.u32 4294901760, %v541_v28  ;;  %v548_v8 = vld [vmem:[#allocation7 + $0x70] sm:$0xff]  ;;  %v549_v9 = vld [vmem:[#allocation7 + $0x78] sm:$0xff] }
  0x3e   :  { %v155_v33 = vsub.f32 %v153_v16, %v154_v25  ;;  %v162_v34 = vsub.f32 %v160_v17, %v161_v26  ;;  %v1602_v35 = vpack.c.bf16 %v161_v26, %v154_v25  ;;  %v1975_v38 = vsub.f32 %v538_v19, %v570_v32  ;;  %p1853_p13 = por %p1852_p12, %p1851_p11 }
  0x3f   :  { %1363 = vmatmul.mubr.f32.vlgmr.msra.gmra.mrb[0].mxu0 %v143_v29  ;;  %v144_v37 = vsub.f32 %v142_v20, %v143_v29  ;;  %v1979_v43 = vsub.f32 %v539_v24, %v573_v36  ;;  %v1982_v45 = vsub.f32 %v540_v27, %v576_v39  ;;  %v1984_v46 = vsub.f32 %v541_v28, %v579_v40 }
  0x40   :  { %v156_v41 = vand.u32 4294901760, %v155_v33  ;;  %v163_v42 = vand.u32 4294901760, %v162_v34  ;;  %1603 = vmatpush3.bf16.msra.mxu0 %v1602_v35  ;;  %1369 = vmatprep.mubr.msk.f32.mxu0 %vm1880_vm0, %v1881_v1  ;;  %v1596_v48 = vpack.c.bf16 %v160_v17, %v153_v16  ;;  %v1995_v49 = vpack.c.bf16 %v561_v13, %v558_v12  ;;  %p1854_p0 = pnand %p1853_p13, %p1847_p10 }
  0x41   :  { %v145_v44 = vand.u32 4294901760, %v144_v37  ;;  %1604 = vmatprep.subr.bf16.mxu0 %v1879_v0  ;;  %v2001_v50 = vpack.c.bf16 %v567_v23, %v564_v18  ;;  %v2007_v51 = vpack.c.bf16 %v573_v36, %v570_v32  ;;  %v2015_v52 = vpack.c.bf16 %v579_v40, %v576_v39 }
  0x42   :  { %v1593_v47 = vpack.c.bf16 %v163_v42, %v156_v41  ;;  %v582_v55 = vand.u32 4294901760, %v542_v53  ;;  %v585_v56 = vand.u32 4294901760, %v543_v54  ;;  %v588_v62 = vand.u32 4294901760, %v544_v58 }
  0x43   :  { %1342 = vmatmul.mubr.f32.vlgmr.msra.gmra.mrb[0].mxu1 %v145_v44  ;;  %v591_v63 = vand.u32 4294901760, %v545_v59  ;;  %v594_v5 = vand.u32 4294901760, %v546_v3  ;;  %v597_v6 = vand.u32 4294901760, %v547_v4  ;;  %v600_v10 = vand.u32 4294901760, %v548_v8 }
  0x44   :  { %1594 = vmatpush3.bf16.msra.mxu1 %v1593_v47  ;;  %1348 = vmatprep.mubr.msk.f32.mxu1 %vm1880_vm0, %v1881_v1  ;;  %v2023_v57 = vpack.c.bf16 %v585_v56, %v582_v55  ;;  %v2025_v60 = vsub.f32 %v542_v53, %v582_v55  ;;  %v2027_v61 = vsub.f32 %v543_v54, %v585_v56  ;;  %v651_v19 = vand.u32 4294901760, %v1964_v21 }
  0x45   :  { %1595 = vmatprep.subr.bf16.mxu1 %v1879_v0  ;;  %v2033_v2 = vpack.c.bf16 %v591_v63, %v588_v62  ;;  %v2039_v7 = vpack.c.bf16 %v597_v6, %v594_v5  ;;  %v2047_v13 = vsub.f32 %v544_v58, %v588_v62  ;;  %v2049_v14 = vsub.f32 %v545_v59, %v591_v63 }
  0x46   :  { %v2053_v16 = vsub.f32 %v547_v4, %v597_v6  ;;  %v2056_v17 = vsub.f32 %v548_v8, %v600_v10  ;;  %v652_v24 = vsub.f32 %v1964_v21, %v651_v19  ;;  %v665_v28 = vand.u32 4294901760, %v1971_v30 }
  0x47   :  { %1370 = vmatmul.mubr.f32.vlgmr.msra.gmra.mrb[0].mxu0 %v141_v11  ;;  %v672_v29 = vand.u32 4294901760, %v1973_v31  ;;  %v679_v39 = vand.u32 4294901760, %v1975_v38  ;;  %v686_v40 = vand.u32 4294901760, %v1979_v43  ;;  %v693_v54 = vand.u32 4294901760, %v1982_v45 }
  0x48   :  { %1606 = vmatpush3.bf16.msra.mxu0 %v1590_v15  ;;  %1376 = vmatprep.mubr.msk.f32.mxu0 %vm1880_vm0, %v1881_v1  ;;  %v2051_v15 = vsub.f32 %v546_v3, %v594_v5  ;;  %v653_v26 = vand.u32 4294901760, %v652_v24  ;;  %v666_v34 = vsub.f32 %v1971_v30, %v665_v28  ;;  %v700_v55 = vand.u32 4294901760, %v1984_v46 }
  0x49   :  { %1607 = vmatprep.subr.bf16.mxu0 %v1879_v0  ;;  %v2073_v33 = vpack.c.bf16 %v672_v29, %v665_v28  ;;  %v673_v35 = vsub.f32 %v1973_v31, %v672_v29  ;;  %v2081_v42 = vpack.c.bf16 %v686_v40, %v679_v39  ;;  %v680_v44 = vsub.f32 %v1975_v38, %v679_v39 }
  0x4a   :  { %v667_v36 = vand.u32 4294901760, %v666_v34  ;;  %v687_v47 = vsub.f32 %v1979_v43, %v686_v40  ;;  %v2089_v58 = vpack.c.bf16 %v700_v55, %v693_v54  ;;  %v694_v59 = vsub.f32 %v1982_v45, %v693_v54 }
  0x4b   :  { %1349 = vmatmul.mubr.f32.vlgmr.msra.gmra.mrb[0].mxu1 %v141_v11  ;;  %v674_v37 = vand.u32 4294901760, %v673_v35  ;;  %v701_v62 = vsub.f32 %v1984_v46, %v700_v55  ;;  %v707_v4 = vand.u32 4294901760, %v2025_v60  ;;  %v714_v5 = vand.u32 4294901760, %v2027_v61 }
  0x4c   :  { %1597 = vmatpush3.bf16.msra.mxu1 %v1596_v48  ;;  %1355 = vmatprep.mubr.msk.f32.mxu1 %vm1880_vm0, %v1881_v1  ;;  %v681_v48 = vand.u32 4294901760, %v680_v44  ;;  %v688_v53 = vand.u32 4294901760, %v687_v47  ;;  %v695_v63 = vand.u32 4294901760, %v694_v59  ;;  %v728_v24 = vand.u32 4294901760, %v2049_v14 }
  0x4d   :  { %1679 = vmatprep.subr.bf16.mxu1 %v1879_v0  ;;  %v2079_v41 = vpack.c.bf16 %v674_v37, %v667_v36  ;;  %v702_v3 = vand.u32 4294901760, %v701_v62  ;;  %v2097_v8 = vpack.c.bf16 %v714_v5, %v707_v4  ;;  %v735_v35 = vand.u32 4294901760, %v2051_v15 }
  0x4e   :  { %v2087_v56 = vpack.c.bf16 %v688_v53, %v681_v48  ;;  %v729_v28 = vsub.f32 %v2049_v14, %v728_v24  ;;  %v742_v36 = vand.u32 4294901760, %v2053_v16  ;;  %v749_v53 = vand.u32 4294901760, %v2056_v17 }
  0x4f   :  { %1377 = vmatmul.mubr.f32.vlgmr.msra.gmra.mrb[0].mxu0 %v141_v11  ;;  %v603_v11 = vand.u32 4294901760, %v549_v9  ;;  %v2095_v6 = vpack.c.bf16 %v702_v3, %v695_v63  ;;  %v736_v40 = vsub.f32 %v2051_v15, %v735_v35 }
  0x50   :  { %1609 = vmatpush3.bf16.msra.mxu0 %v1995_v49  ;;  %1411 = vmatprep.mubr.msk.f32.mxu0 %vm1880_vm0, %v1881_v1  ;;  %v730_v34 = vand.u32 4294901760, %v729_v28  ;;  %v1722_v39 = vpack.c.bf16 %v742_v36, %v735_v35  ;;  %v743_v44 = vsub.f32 %v2053_v16, %v742_v36  ;;  %v750_v62 = vsub.f32 %v2056_v17, %v749_v53 }
  0x51   :  { %1610 = vmatprep.subr.bf16.mxu0 %v1879_v0  ;;  %v2045_v12 = vpack.c.bf16 %v603_v11, %v600_v10  ;;  %v2058_v18 = vsub.f32 %v549_v9, %v603_v11  ;;  %v708_v9 = vsub.f32 %v2025_v60, %v707_v4  ;;  %v715_v10 = vsub.f32 %v2027_v61, %v714_v5 }
  0x52   :  { %v737_v47 = vand.u32 4294901760, %v736_v40  ;;  %v744_v48 = vand.u32 4294901760, %v743_v44  ;;  %v751_v3 = vand.u32 4294901760, %v750_v62 }
  0x53   :  { %1356 = vmatmul.mubr.f32.vlgmr.msra.gmra.mrb[0].mxu1 %v142_v20  ;;  %v658_v20 = vand.u32 4294901760, %v1966_v22  ;;  %v709_v11 = vand.u32 4294901760, %v708_v9  ;;  %v756_v54 = vand.u32 4294901760, %v2058_v18  ;;  %v1656_v9 = vpack.c.bf16 %v1966_v22, %v1964_v21 }
  0x54   :  { %1681 = vmatpush3.bf16.msra.mxu1 %v1995_v49  ;;  %1612 = vmatpush3.bf16.msra.mxu0 %v2001_v50  ;;  %v1650_v55 = vpack.c.bf16 %v744_v48, %v737_v47  ;;  %v1677_v21 = vpack.c.bf16 %v2058_v18, %v2056_v17 }
  0x55   :  { %1682 = vmatprep.subr.bf16.mxu1 %v1879_v0  ;;  %1613 = vmatprep.subr.bf16.mxu0 %v1879_v0  ;;  %v2065_v23 = vpack.c.bf16 %v658_v20, %v651_v19  ;;  %v659_v25 = vsub.f32 %v1966_v22, %v658_v20  ;;  %v716_v19 = vand.u32 4294901760, %v715_v10  ;;  %v721_v20 = vand.u32 4294901760, %v2047_v13 }
  0x56   :  { %1516 = vmatprep.mubr.msk.f32.mxu1 %vm1880_vm0, %v1881_v1  ;;  %v1725_v59 = vpack.c.bf16 %v756_v54, %v749_v53  ;;  %v757_v63 = vsub.f32 %v2058_v18, %v756_v54  ;;  %v1659_v10 = vpack.c.bf16 %v1973_v31, %v1971_v30  ;;  %v1216_v31 = vld [vmem:[%s2244_s4] ss:$0 sm:$0xff] }
  0x57   :  { %v660_v27 = vand.u32 4294901760, %v659_v25  ;;  %v2103_v25 = vpack.c.bf16 %v716_v19, %v709_v11  ;;  %v1662_v11 = vpack.c.bf16 %v1979_v43, %v1975_v38  ;;  %v1665_v19 = vpack.c.bf16 %v1984_v46, %v1982_v45 }
  0x58   :  { %1684 = vmatpush3.bf16.msra.mxu1 %v2001_v50  ;;  %1615 = vmatpush3.bf16.msra.mxu0 %v2007_v51  ;;  %v758_v4 = vand.u32 4294901760, %v757_v63 }
  0x59   :  { %1685 = vmatprep.subr.bf16.mxu1 %v1879_v0  ;;  %1616 = vmatprep.subr.bf16.mxu0 %v1879_v0  ;;  %v2071_v32 = vpack.c.bf16 %v660_v27, %v653_v26  ;;  %v2105_v26 = vpack.c.bf16 %v728_v24, %v721_v20  ;;  %v722_v27 = vsub.f32 %v2047_v13, %v721_v20 }
  0x5a   :  { %v1653_v5 = vpack.c.bf16 %v758_v4, %v751_v3  ;;  %v1668_v20 = vpack.c.bf16 %v2027_v61, %v2025_v60  ;;  %v1671_v24 = vpack.c.bf16 %v2049_v14, %v2047_v13 }
  0x5b   :  { %v723_v29 = vand.u32 4294901760, %v722_v27  ;;  %v1674_v27 = vpack.c.bf16 %v2053_v16, %v2051_v15 }
  0x5c   :  { %1687 = vmatpush3.bf16.msra.mxu1 %v2007_v51  ;;  %1618 = vmatpush3.bf16.msra.mxu0 %v2015_v52 }
  0x5d   :  { %1688 = vmatprep.subr.bf16.mxu1 %v1879_v0  ;;  %1619 = vmatprep.subr.bf16.mxu0 %v1879_v0  ;;  %v1647_v37 = vpack.c.bf16 %v730_v34, %v723_v29  ;;  %v1215_v29 = vld [vmem:[%s2242_s2] ss:$0 sm:$0xff] }
  0x60   :  { %1690 = vmatpush3.bf16.msra.mxu1 %v2015_v52  ;;  %1621 = vmatpush3.bf16.msra.mxu0 %v2023_v57 }
  0x61   :  { %1691 = vmatprep.subr.bf16.mxu1 %v1879_v0  ;;  %1622 = vmatprep.subr.bf16.mxu0 %v1879_v0 }
  0x64   :  { %1693 = vmatpush3.bf16.msra.mxu1 %v2023_v57  ;;  %1624 = vmatpush3.bf16.msra.mxu0 %v2033_v2 }
  0x65   :  { %1694 = vmatprep.subr.bf16.mxu1 %v1879_v0  ;;  %1625 = vmatprep.subr.bf16.mxu0 %v1879_v0 }
  0x68   :  { %1696 = vmatpush3.bf16.msra.mxu1 %v2033_v2  ;;  %1627 = vmatpush3.bf16.msra.mxu0 %v2039_v7 }
  0x69   :  { %1697 = vmatprep.subr.bf16.mxu1 %v1879_v0  ;;  %1628 = vmatprep.subr.bf16.mxu0 %v1879_v0 }
  0x6c   :  { %1699 = vmatpush3.bf16.msra.mxu1 %v2039_v7  ;;  %1630 = vmatpush3.bf16.msra.mxu0 %v2045_v12 }
  0x6d   :  { %1700 = vmatprep.subr.bf16.mxu1 %v1879_v0  ;;  %1631 = vmatprep.subr.bf16.mxu0 %v1879_v0 }
  0x70   :  { %1702 = vmatpush3.bf16.msra.mxu1 %v2045_v12 }
  0x71   :  { %1703 = vmatprep.subr.bf16.mxu1 %v1879_v0 }
 0x122   :  { %v529_v22 = vpop.f32.mrb[0].mxu0 }
 0x123   :  { %v1378_v28 = vpop.f32.mrb[1].mxu0 }
 0x126   :  { %v304_v34 = vpop.f32.mrb[0].mxu1 }
 0x127   :  { %v1751_v35 = vadd.f32 %v1215_v29, %v304_v34  ;;  %v1357_v36 = vpop.f32.mrb[1].mxu1 }
 0x129   :  { %v1752_v40 = vadd.f32 %v1751_v35, %v529_v22 }
 0x12b   :  { %v533_v44 = vmax.f32 %v1752_v40, 0.0 }
 0x12d   :  { %v2136_v47 = vand.u32 4294901760, %v533_v44 }
 0x12f   :  { %v2139_v48 = vsub.f32 %v533_v44, %v2136_v47 }
 0x131   :  { %v640_v53 = vand.u32 4294901760, %v2139_v48 }
 0x133   :  { %1517 = vmatmul.mubr.f32.vlgmr.msra.gmra.mrb[2].mxu1 %v640_v53  ;;  %v641_v54 = vsub.f32 %v2139_v48, %v640_v53 }
 0x134   :  { %1705 = vmatpush3.bf16.msra.mxu1 %v2065_v23  ;;  %1551 = vmatprep.mubr.msk.f32.mxu1 %vm1880_vm0, %v1881_v1 }
 0x135   :  { %1706 = vmatprep.subr.bf16.mxu1 %v1879_v0  ;;  %v642_v62 = vand.u32 4294901760, %v641_v54 }
 0x137   :  { %1412 = vmatmul.mubr.f32.vlgmr.msra.gmra.mrb[2].mxu0 %v642_v62 }
 0x138   :  { %1633 = vmatpush3.bf16.msra.mxu0 %v2071_v32  ;;  %1708 = vmatpush3.bf16.msra.mxu1 %v2073_v33 }
 0x139   :  { %1634 = vmatprep.subr.bf16.mxu0 %v1879_v0  ;;  %1709 = vmatprep.subr.bf16.mxu1 %v1879_v0 }
 0x13a   :  { %1446 = vmatprep.mubr.msk.f32.mxu0 %vm1880_vm0, %v1881_v1 }
 0x13c   :  { %1636 = vmatpush3.bf16.msra.mxu0 %v2079_v41  ;;  %1711 = vmatpush3.bf16.msra.mxu1 %v2081_v42 }
 0x13d   :  { %1637 = vmatprep.subr.bf16.mxu0 %v1879_v0  ;;  %1712 = vmatprep.subr.bf16.mxu1 %v1879_v0 }
 0x140   :  { %1639 = vmatpush3.bf16.msra.mxu0 %v2087_v56  ;;  %1714 = vmatpush3.bf16.msra.mxu1 %v2089_v58 }
 0x141   :  { %1640 = vmatprep.subr.bf16.mxu0 %v1879_v0  ;;  %1715 = vmatprep.subr.bf16.mxu1 %v1879_v0 }
 0x144   :  { %1642 = vmatpush3.bf16.msra.mxu0 %v2095_v6  ;;  %1717 = vmatpush3.bf16.msra.mxu1 %v2097_v8 }
 0x145   :  { %1643 = vmatprep.subr.bf16.mxu0 %v1879_v0  ;;  %1718 = vmatprep.subr.bf16.mxu1 %v1879_v0 }
 0x148   :  { %1645 = vmatpush3.bf16.msra.mxu0 %v2103_v25  ;;  %1720 = vmatpush3.bf16.msra.mxu1 %v2105_v26 }
 0x149   :  { %1646 = vmatprep.subr.bf16.mxu0 %v1879_v0  ;;  %1721 = vmatprep.subr.bf16.mxu1 %v1879_v0 }
 0x14c   :  { %1648 = vmatpush3.bf16.msra.mxu0 %v1647_v37  ;;  %1723 = vmatpush3.bf16.msra.mxu1 %v1722_v39 }
 0x14d   :  { %1649 = vmatprep.subr.bf16.mxu0 %v1879_v0  ;;  %1724 = vmatprep.subr.bf16.mxu1 %v1879_v0 }
 0x150   :  { %1651 = vmatpush3.bf16.msra.mxu0 %v1650_v55  ;;  %1726 = vmatpush3.bf16.msra.mxu1 %v1725_v59 }
 0x151   :  { %1652 = vmatprep.subr.bf16.mxu0 %v1879_v0  ;;  %1727 = vmatprep.subr.bf16.mxu1 %v1879_v0 }
 0x153   :  { %1552 = vmatmul.mubr.f32.vlgmr.msra.gmra.mrb[2].mxu1 %v2136_v47 }
 0x154   :  { %1654 = vmatpush3.bf16.msra.mxu0 %v1653_v5  ;;  %1729 = vmatpush3.bf16.msra.mxu1 %v1995_v49 }
 0x155   :  { %1655 = vmatprep.subr.bf16.mxu0 %v1879_v0  ;;  %1730 = vmatprep.subr.bf16.mxu1 %v1879_v0 }
 0x156   :  { %1586 = vmatprep.mubr.msk.f32.mxu1 %vm1880_vm0, %v1881_v1 }
 0x157   :  { %1447 = vmatmul.mubr.f32.vlgmr.msra.gmra.mrb[2].mxu0 %v2136_v47 }
 0x158   :  { %1657 = vmatpush3.bf16.msra.mxu0 %v1656_v9  ;;  %1732 = vmatpush3.bf16.msra.mxu1 %v2001_v50 }
 0x159   :  { %1658 = vmatprep.subr.bf16.mxu0 %v1879_v0  ;;  %1733 = vmatprep.subr.bf16.mxu1 %v1879_v0 }
 0x15a   :  { %1481 = vmatprep.mubr.msk.f32.mxu0 %vm1880_vm0, %v1881_v1 }
 0x15c   :  { %1660 = vmatpush3.bf16.msra.mxu0 %v1659_v10  ;;  %1735 = vmatpush3.bf16.msra.mxu1 %v2007_v51 }
 0x15d   :  { %1661 = vmatprep.subr.bf16.mxu0 %v1879_v0  ;;  %1736 = vmatprep.subr.bf16.mxu1 %v1879_v0 }
 0x160   :  { %1663 = vmatpush3.bf16.msra.mxu0 %v1662_v11  ;;  %1738 = vmatpush3.bf16.msra.mxu1 %v2015_v52 }
 0x161   :  { %1664 = vmatprep.subr.bf16.mxu0 %v1879_v0  ;;  %1739 = vmatprep.subr.bf16.mxu1 %v1879_v0 }
 0x164   :  { %1666 = vmatpush3.bf16.msra.mxu0 %v1665_v19  ;;  %1741 = vmatpush3.bf16.msra.mxu1 %v2023_v57 }
 0x165   :  { %1667 = vmatprep.subr.bf16.mxu0 %v1879_v0  ;;  %1742 = vmatprep.subr.bf16.mxu1 %v1879_v0 }
 0x168   :  { %1669 = vmatpush3.bf16.msra.mxu0 %v1668_v20  ;;  %1744 = vmatpush3.bf16.msra.mxu1 %v2033_v2 }
 0x169   :  { %1670 = vmatprep.subr.bf16.mxu0 %v1879_v0  ;;  %1745 = vmatprep.subr.bf16.mxu1 %v1879_v0 }
 0x16c   :  { %1672 = vmatpush3.bf16.msra.mxu0 %v1671_v24  ;;  %1747 = vmatpush3.bf16.msra.mxu1 %v2039_v7 }
 0x16d   :  { %1673 = vmatprep.subr.bf16.mxu0 %v1879_v0  ;;  %1748 = vmatprep.subr.bf16.mxu1 %v1879_v0 }
 0x170   :  { %1675 = vmatpush3.bf16.msra.mxu0 %v1674_v27  ;;  %1750 = vmatpush3.bf16.msra.mxu1 %v2045_v12 }
 0x171   :  { %1676 = vmatprep.subr.bf16.mxu0 %v1879_v0 }
 0x173   :  { %1587 = vmatmul.mubr.f32.vlgmr.msra.gmra.mrb[2].mxu1 %v2136_v47 }
 0x174   :  { %1678 = vmatpush3.bf16.msra.mxu0 %v1677_v21 }
 0x177   :  { %1482 = vmatmul.mubr.f32.vlgmr.msra.gmra.mrb[2].mxu0 %v2139_v48 }
 0x246   :  { %v1194_v1 = vpop.f32.mrb[2].mxu1 }
 0x247   :  { %v1588_v30 = vpop.f32.mrb[3].mxu1 }
 0x24a   :  { %v899_v38 = vpop.f32.mrb[2].mxu0 }
 0x24b   :  { %v1753_v43 = vadd.f32 %v1216_v31, %v899_v38  ;;  %v1483_v45 = vpop.f32.mrb[3].mxu0 }
 0x24d   :  { %v1754_v0 = vadd.f32 %v1753_v43, %v1194_v1 }
 0x24f   :  { %1198 = vst [vmem:[#allocation8] sm:$0xff] %v1754_v0 }
 0x250   :  { %1857 = shalt.err (!%p1854_p0)
}
 0x251   :  { %s1858_s11 = scalar_lea.hbm %s2245_s5, 128 }
 0x252   :  { %p1859_p1 = scmp.ne.s32.totalorder %s2245_s5, %s1858_s11  ;;  %p1862_p2 = scmp.lt.u32.totalorder %s1858_s11, %s2245_s5 }
 0x254   :  { %p1864_p3 = pnand %p1862_p2, %p1859_p1 }
 0x256   :  { %1867 = shalt.err (!%p1864_p3)
}
 0x257   :  { %1208 = dma.vmem_to_hbm [thread:$0]  %s1206_s7, 128, %s2245_s5, [#allocation4]  }
 0x258   :  { %1872 = dma.done.wait [#allocation4], 128  }
 0x259   :  { %1873 = vsyncadd [#allocation4], 4294967168 }
 0x25a   :  { %1212 = vsyncpa [#allocation3], 1 }
 0x25b   :  { %1213 = vsyncpa [#allocation6], 1 }
 0x25c   :  { %1214 = vsyncpa [#allocation4], 1 }

</bundles_post_ra>
